<compile_context>
chip_gen: v6e
topology: v6e:2x2x1
jax: 0.10.0
libtpu: 0.0.40
codegen_flags: <defaults>
</compile_context>

<pallas_src>
import jax
import jax.numpy as jnp
from jax.experimental import pallas as pl
from jax.experimental.pallas import tpu as pltpu


def _linear_classifier_kernel(x1_ref, x2_ref, wt_ref, b_ref, o_ref):
    # x1_ref, x2_ref: [B, D]   wt_ref: [2D, C]   b_ref: [1, C]   o_ref: [B, C]
    # Build the concatenated feature in-kernel (lane placement via XLU) and
    # issue a single MXU matmul with f32 accumulation.
    xcat = jnp.concatenate([x1_ref[...], x2_ref[...]], axis=-1)  # [B, 2D]
    acc = jnp.dot(xcat, wt_ref[...], preferred_element_type=jnp.float32)
    o_ref[...] = (acc + b_ref[...]).astype(o_ref.dtype)


def prepare_params(weight, bias):
    """One-time parameter prep (hoisted out of the per-call path).

    weight: [C, 2D] (PyTorch nn.Linear convention)  ->  wt: [2D, C]
    bias:   [C]                                     ->  b2d: [1, C]
    """
    wt = jnp.transpose(weight)        # [2D, C], MXU-friendly orientation
    b2d = bias.reshape(1, -1)         # keep 2-D for TPU layout
    return wt, b2d


def linear_classifier_forward(x1, x2, wt, b2d):
    """Pallas forward of LinearClassifier.

    x1, x2: [B, D] float32
    wt:     [2D, C] float32 (pre-transposed weight)
    b2d:    [1, C] float32
    returns [B, C] float32
    """
    B, D = x1.shape
    twoD, C = wt.shape
    assert twoD == 2 * D and b2d.shape == (1, C)

    vmem = pl.BlockSpec(memory_space=pltpu.MemorySpace.VMEM)
    out = pl.pallas_call(
        _linear_classifier_kernel,
        out_shape=jax.ShapeDtypeStruct((B, C), x1.dtype),
        in_specs=[vmem, vmem, vmem, vmem],
        out_specs=vmem,
    )(x1, x2, wt, b2d)
    return out


if __name__ == "__main__":
    # Module hyper-params (synthetic, deterministic init — matches __init__ shapes).
    in_dim = 32
    classify_num = 2
    batch = 8

    key = jax.random.PRNGKey(0)
    k_w, k_x1, k_x2 = jax.random.split(key, 3)

    # nn.Linear(in_dim*2, classify_num): weight ~ N(0, 0.01), bias = 0
    weight = 0.01 * jax.random.normal(k_w, (classify_num, in_dim * 2), dtype=jnp.float32)
    bias = jnp.zeros((classify_num,), dtype=jnp.float32)

    image_data1 = jax.random.normal(k_x1, (batch, in_dim), dtype=jnp.float32)
    image_data2 = jax.random.normal(k_x2, (batch, in_dim), dtype=jnp.float32)

    # Hoisted, one-time param prep (weights are static across calls).
    wt, b2d = prepare_params(weight, bias)

    out = linear_classifier_forward(image_data1, image_data2, wt, b2d)
    out = jax.block_until_ready(out)

    # Reference check against plain JAX (torch semantics: cat(dim=1) then Linear).
    ref = jnp.concatenate([image_data1, image_data2], axis=1) @ weight.T + bias
    assert out.shape == (batch, classify_num)
    assert jnp.allclose(out, ref, atol=1e-5, rtol=1e-5)

    print("KERNEL_OK")
</pallas_src>

<mosaic_0001>
module attributes {stable_mosaic.version = 11 : i64} {
  func.func @_linear_classifier_kernel(%arg0: memref<8x32xf32, #tpu.memory_space<vmem>>, %arg1: memref<8x32xf32, #tpu.memory_space<vmem>>, %arg2: memref<64x2xf32, #tpu.memory_space<vmem>>, %arg3: memref<1x2xf32, #tpu.memory_space<vmem>>, %arg4: memref<8x2xf32, #tpu.memory_space<vmem>>) attributes {dimension_semantics = [], scalar_prefetch = 0 : i64, scratch_operands = 0 : i64, tpu.core_type = #tpu.core_type<tc>} {
    %c0 = arith.constant 0 : index
    %c0_0 = arith.constant 0 : index
    %0 = vector.load %arg0[%c0, %c0_0] : memref<8x32xf32, #tpu.memory_space<vmem>>, vector<8x32xf32>
    %c0_1 = arith.constant 0 : index
    %c0_2 = arith.constant 0 : index
    %1 = vector.load %arg1[%c0_1, %c0_2] : memref<8x32xf32, #tpu.memory_space<vmem>>, vector<8x32xf32>
    %2 = tpu.concatenate %0, %1 in 1 : vector<8x32xf32>, vector<8x32xf32> -> vector<8x64xf32>
    %c0_3 = arith.constant 0 : index
    %c0_4 = arith.constant 0 : index
    %3 = vector.load %arg2[%c0_3, %c0_4] : memref<64x2xf32, #tpu.memory_space<vmem>>, vector<64x2xf32>
    %cst = arith.constant dense<0.000000e+00> : vector<8x2xf32>
    %4 = tpu.matmul %2, %3, %cst {dimension_numbers = #tpu.dot_dimension_numbers<[1], [0], [0], [1], [0, 0, 1, 1], [], []>} : vector<8x64xf32>, vector<64x2xf32>, vector<8x2xf32> -> vector<8x2xf32>
    %c0_5 = arith.constant 0 : index
    %c0_6 = arith.constant 0 : index
    %5 = vector.load %arg3[%c0_5, %c0_6] : memref<1x2xf32, #tpu.memory_space<vmem>>, vector<1x2xf32>
    %6 = vector.broadcast %5 : vector<1x2xf32> to vector<8x2xf32>
    %7 = arith.addf %4, %6 : vector<8x2xf32>
    %c0_7 = arith.constant 0 : index
    %c0_8 = arith.constant 0 : index
    %8 = vector.load %arg4[%c0_7, %c0_8] : memref<8x2xf32, #tpu.memory_space<vmem>>, vector<8x2xf32>
    tpu.vector_store %arg4[%c0_7, %c0_8], %7 {strides = array<i32>} : memref<8x2xf32, #tpu.memory_space<vmem>>, vector<8x2xf32>,
    return
  }
}

</mosaic_0001>

<bundles_post_ra>
// kernel: tpu_custom_call.1
= control target key start
LH: loop header
LB: loop body
LE: loop exit
PB: predicated region body
PF: predicated region fallthrough
CT: control target
= control target key end

     0   :  { %v153_v1 = vmov 0.0   ;;  %vm154_vm0 = vmmov 0   ;;  %s155_s21 = smov 32   ;;  %vm23_vm1 = vcmask 261120   ;;  %vm40_vm2 = vcmask 523264   ;;  %s217_s1 = inlined_call_operand.vmem [shape: f32[8,32], index: 1, kind: input, shape index: {}]   ;;  %s218_s2 = inlined_call_operand.vmem [shape: f32[64,2], index: 2, kind: input, shape index: {}]   ;;  %s219_s0 = inlined_call_operand.vmem [shape: f32[8,32], index: 0, kind: input, shape index: {}]   ;;  %s220_s3 = inlined_call_operand.vmem [shape: f32[1,2], index: 3, kind: input, shape index: {}]   ;;  %s221_s4 = inlined_call_operand.vmem [shape: f32[8,2], index: 4, kind: output, shape index: {}]  }
   0x1   :  { %v18_v0 = vld [vmem:[%s217_s1] sm:$0xff]  ;;  %131 = vmatprep.subr.mxu0 %v153_v1  ;;  %v32_v2 = vld [vmem:[%s218_s2 + $0x38] sm:$0xff]  ;;  %v31_v3 = vld [vmem:[%s218_s2 + $0x30] sm:$0xff]  ;;  %147 = vmatprep.mubr.msk.f32.mxu0 %vm154_vm0, %v153_v1  ;;  %vm114_vm3 = vcmask 15360  }
   0x2   :  { %20 = vrot.lane.b32.xlu0 %v18_v0, %s155_s21  ;;  %132 = vmatpush3.msra.mxu0 %v32_v2  ;;  %v30_v4 = vld [vmem:[%s218_s2 + $0x28] sm:$0xff]  ;;  %v29_v5 = vld [vmem:[%s218_s2 + $0x20] sm:$0xff]  ;;  %v28_v6 = vld [vmem:[%s218_s2 + $0x18] sm:$0xff] }
   0x3   :  { %133 = vmatprep.subr.mxu0 %v153_v1  ;;  %v27_v7 = vld [vmem:[%s218_s2 + $0x10] sm:$0xff]  ;;  %v26_v8 = vld [vmem:[%s218_s2 + $0x8] sm:$0xff]  ;;  %v25_v9 = vld [vmem:[%s218_s2] sm:$0xff] }
   0x4   :  { %134 = vmatpush3.msra.mxu0 %v31_v3  ;;  %v17_v10 = vld [vmem:[%s219_s0] sm:$0xff] }
   0x5   :  { %135 = vmatprep.subr.mxu0 %v153_v1  ;;  %v120_v13 = vld [vmem:[%s220_s3] ss:$0 sm:$0xff] }
   0x6   :  { %136 = vmatpush3.msra.mxu0 %v30_v4 }
   0x7   :  { %137 = vmatprep.subr.mxu0 %v153_v1 }
   0x8   :  { %138 = vmatpush3.msra.mxu0 %v29_v5 }
   0x9   :  { %139 = vmatprep.subr.mxu0 %v153_v1 }
   0xa   :  { %140 = vmatpush3.msra.mxu0 %v28_v6 }
   0xb   :  { %141 = vmatprep.subr.mxu0 %v153_v1 }
   0xc   :  { %142 = vmatpush3.msra.mxu0 %v27_v7 }
   0xd   :  { %143 = vmatprep.subr.mxu0 %v153_v1 }
   0xe   :  { %144 = vmatpush3.msra.mxu0 %v26_v8 }
   0xf   :  { %145 = vmatprep.subr.mxu0 %v153_v1 }
  0x10   :  { %146 = vmatpush3.msra.mxu0 %v25_v9 }
  0x74   :  { %v21_v11 = vpop.permute.xlu0 %20 }
  0x75   :  { %v24_v12 = vsel %vm23_vm1, %v17_v10, %v21_v11 }
  0x76   :  { %148 = vmatmul.mubr.msk.f32.vlgmr.msra.gmra.mxu0 %vm40_vm2, %v24_v12 }
 0x136   :  { %v110_v14 = vpop.f32.mrf.mxu0 }
 0x137   :  { %v111_v15 = vadd.f32 %v120_v13, %v110_v14 }
 0x138   :  { %v149_v16 = vpop.f32.mrf.mxu0 }
 0x139   :  { %115 = vst.msk [vmem:[%s221_s4] sm:$0xff] %vm114_vm3, %v111_v15 }

</bundles_post_ra>
